<compile_context>
chip_gen: v5e
topology: v5e:2x2
jax: 0.10.0
libtpu: 0.0.40
codegen_flags: <defaults>
</compile_context>

<pallas_src>
import jax
import jax.numpy as jnp
from jax.experimental import pallas as pl
from jax.experimental.pallas import tpu as pltpu

N_DIMS = 7
TEMPERATURE = 0.5

# Lane tile for the (D, M) layout kernel: 65536 lanes -> ~2 MiB per buffer
# (8-sublane padded f32); double-buffered x + out ~= 8 MiB of VMEM.
TARGET_TN = 65536
# Row tile for the (M, D) layout kernel: 8192 rows -> 4 MiB per f32 buffer
# (lane dim 7 pads to 128 in VMEM); double-buffered x + out ~= 16 MiB.
TARGET_TM = 8192


def _round_up(n, m):
    return -(-n // m) * m


def _num_tensorcores():
    # v7x has 2 TensorCores per chip; v5e/v6e have 1.  Only v7x benefits from
    # splitting small problems into >= 2 grid steps under ("parallel",).
    try:
        kind = (getattr(jax.devices()[0], "device_kind", "") or "").lower()
        return 2 if "v7" in kind else 1
    except Exception:  # pragma: no cover
        return 1


_NUM_TC = _num_tensorcores()


def _choose_tn(M):
    """Lane tile (multiple of 128) for the (D, M) kernel."""
    m128 = _round_up(max(int(M), 1), 128)
    tn = min(TARGET_TN, m128)
    if _NUM_TC > 1 and m128 >= 256:
        # Keep >= 2 balanced grid steps so both v7x TensorCores get work.
        half = _round_up(-(-m128 // 2), 128)
        tn = min(tn, half)
    return max(128, _round_up(tn, 128))


def _choose_tm(M):
    """Row tile (multiple of 8) for the (M, D) kernel."""
    m8 = _round_up(max(int(M), 1), 8)
    tm = min(TARGET_TM, m8)
    if _NUM_TC > 1 and m8 >= 16:
        half = _round_up(-(-m8 // 2), 8)
        tm = min(tm, half)
    return max(8, _round_up(tm, 8))


def _vmem_limit(buffer_bytes):
    # buffer_bytes already includes double-buffering; add headroom, keep a
    # floor for compiler scratch and a cap safely under v7x's 64 MiB physical.
    return int(min(max(2 * buffer_bytes + (4 << 20), 16 << 20), 48 << 20))


# --------------------------------------------------------------------------
# Kernels
# --------------------------------------------------------------------------
def _softattn_lanes_kernel(attn_ref, bias_ref, x_ref, o_ref):
    # attn_ref: SMEM (D,) f32   gumbel-softmax attention, pre-scaled by Linear w
    # bias_ref: SMEM (1,) f32   Linear bias
    # x_ref:    VMEM (D, tn)    input tile, tokens lane-dense (bf16/f32)
    # o_ref:    VMEM (1, tn) f32
    d = x_ref.shape[0]
    acc = x_ref[0:1, :].astype(jnp.float32) * attn_ref[0]
    for i in range(1, d):  # unrolled vmul/vadd chain; no XLU sublane reduce
        acc = acc + x_ref[i:i + 1, :].astype(jnp.float32) * attn_ref[i]
    o_ref[...] = acc + bias_ref[0]


def _softattn_rows_kernel(bias_ref, attn_ref, x_ref, o_ref):
    # bias_ref: SMEM (1,) f32
    # attn_ref: VMEM (D, 1) f32  weight-scaled attention column (replicated)
    # x_ref:    VMEM (tm, D)     contiguous row tile (bf16/f32)
    # o_ref:    VMEM (tm, 1) f32
    x = x_ref[...].astype(jnp.float32)
    o_ref[...] = jnp.dot(x, attn_ref[...],
                         preferred_element_type=jnp.float32) + bias_ref[0]


# --------------------------------------------------------------------------
# Host-side glue
# --------------------------------------------------------------------------
def _gumbel_softmax_soft(embedding, key, temperature):
    # Tiny 7-element gumbel-softmax: plain-JAX glue, not worth a kernel.
    u = jax.random.uniform(key, embedding.shape,
                           minval=1e-10, maxval=1.0, dtype=jnp.float32)
    g = -jnp.log(-jnp.log(u))                       # standard Gumbel(0,1)
    return jax.nn.softmax((embedding.astype(jnp.float32) + g) / temperature)


def _run_lanes(xt, attn_scaled, bias_arr, tn):
    """xt: (D, M), tokens lane-dense. Returns (1, M) f32 = w*(attn.x)+b."""
    D, M = xt.shape
    itemsize = jnp.dtype(xt.dtype).itemsize
    bufs = 2 * 8 * tn * itemsize + 2 * 8 * tn * 4   # dbl-buffered x + out
    return pl.pallas_call(
        _softattn_lanes_kernel,
        out_shape=jax.ShapeDtypeStruct((1, M), jnp.float32),
        grid=(pl.cdiv(M, tn),),                     # trailing block clipped
        in_specs=[
            pl.BlockSpec(memory_space=pltpu.MemorySpace.SMEM),  # attn (D,)
            pl.BlockSpec(memory_space=pltpu.MemorySpace.SMEM),  # bias (1,)
            pl.BlockSpec((D, tn), lambda i: (0, i)),            # x tile
        ],
        out_specs=pl.BlockSpec((1, tn), lambda i: (0, i)),
        compiler_params=pltpu.CompilerParams(
            dimension_semantics=("parallel",),
            vmem_limit_bytes=_vmem_limit(bufs)),
        cost_estimate=pl.CostEstimate(
            flops=2 * D * M + M, transcendentals=0,
            bytes_accessed=D * M * itemsize + 4 * M),
    )(attn_scaled, bias_arr, xt)


def _run_rows(x2d, attn_col, bias_arr, tm):
    """x2d: (M, D) contiguous rows. Returns (M, 1) f32 = w*(x.attn)+b."""
    M, D = x2d.shape
    itemsize = jnp.dtype(x2d.dtype).itemsize
    # lane dims 7 / 1 both pad to 128 in VMEM.
    bufs = 2 * tm * 128 * itemsize + 2 * tm * 128 * 4
    return pl.pallas_call(
        _softattn_rows_kernel,
        out_shape=jax.ShapeDtypeStruct((M, 1), jnp.float32),
        grid=(pl.cdiv(M, tm),),                     # trailing block clipped
        in_specs=[
            pl.BlockSpec(memory_space=pltpu.MemorySpace.SMEM),  # bias (1,)
            pl.BlockSpec((D, 1), lambda i: (0, 0)),             # attn column
            pl.BlockSpec((tm, D), lambda i: (i, 0)),            # row tile
        ],
        out_specs=pl.BlockSpec((tm, 1), lambda i: (i, 0)),
        compiler_params=pltpu.CompilerParams(
            dimension_semantics=("parallel",),
            vmem_limit_bytes=_vmem_limit(bufs)),
        cost_estimate=pl.CostEstimate(
            flops=2 * D * M + M, transcendentals=0,
            bytes_accessed=D * M * itemsize + 4 * M),
    )(bias_arr, attn_col, x2d)


def g_plaquette_softattn_t(xt, batch, seq, embedding, weight, bias, gumbel_key,
                           temperature=TEMPERATURE, tn=None):
    """Preferred entry point: x already in kernel-native (D, B*L) layout
    (n_dims on sublanes, tokens lane-dense); no host transpose/pad/cast."""
    D, M = xt.shape
    assert D == embedding.shape[0]
    assert M == batch * seq
    attn = _gumbel_softmax_soft(embedding, gumbel_key, temperature)
    attn_scaled = (jnp.float32(weight) * attn).astype(jnp.float32)  # fold w
    bias_arr = jnp.reshape(bias, (1,)).astype(jnp.float32)
    if tn is None:
        tn = _choose_tn(M)
    out = _run_lanes(xt, attn_scaled, bias_arr, tn)                 # (1, M)
    # Pure reshapes of a contiguous (M,) row -> bitcasts, no HBM copy.
    return out[0].reshape(batch, seq)[..., None], attn


def g_plaquette_softattn(x, embedding, weight, bias, gumbel_key,
                         temperature=TEMPERATURE, tm=None):
    """(B, L, D) inputs: rows-layout kernel reads contiguous (tm, D) tiles
    directly from the (B*L, D) view -> no host transpose / pad / up-cast."""
    B, L, D = x.shape
    assert D == embedding.shape[0]
    M = B * L
    attn = _gumbel_softmax_soft(embedding, gumbel_key, temperature)
    attn_col = (jnp.float32(weight) * attn).reshape(D, 1).astype(jnp.float32)
    bias_arr = jnp.reshape(bias, (1,)).astype(jnp.float32)
    if tm is None:
        tm = _choose_tm(M)
    x2d = x.reshape(M, D)                                           # bitcast
    out = _run_rows(x2d, attn_col, bias_arr, tm)                    # (M, 1)
    return out.reshape(B, L, 1), attn


if __name__ == "__main__":
    key = jax.random.PRNGKey(0)
    k_emb, k_x, k_x2, k_x3, k_gumbel = jax.random.split(key, 5)

    # Module parameters (deterministic, matching __init__ defaults):
    #   f.weight = -0.25, f.bias = 0.75, embedding ~ N(0, 0.1), no bias_attn shift
    embedding = 0.1 * jax.random.normal(k_emb, (N_DIMS,), dtype=jnp.float32)
    weight = jnp.float32(-0.25)
    bias = jnp.float32(0.75)

    # --- Case 1: kernel-native (D, B*L) layout, f32 --------------------------
    B, L = 2, 64                                    # M = 128 lanes
    xt = jax.random.normal(k_x, (N_DIMS, B * L), dtype=jnp.float32)
    out, attn = g_plaquette_softattn_t(xt, B, L, embedding, weight, bias, k_gumbel)
    out = jax.block_until_ready(out)
    x_view = xt.T.reshape(B, L, N_DIMS)
    ref = weight * jnp.sum(x_view * attn[None, None, :], axis=-1, keepdims=True) + bias
    assert out.shape == (B, L, 1)
    assert jnp.allclose(out, ref, atol=1e-5, rtol=1e-5)

    # --- Case 2: (B, L, D) bf16 input, ragged M (rows kernel, in-kernel upcast)
    B2, L2 = 3, 50                                  # M = 150 (ragged)
    x2 = jax.random.normal(k_x2, (B2, L2, N_DIMS), dtype=jnp.bfloat16)
    out2, attn2 = g_plaquette_softattn(x2, embedding, weight, bias, k_gumbel)
    out2 = jax.block_until_ready(out2)
    ref2 = weight * jnp.sum(x2.astype(jnp.float32) * attn2[None, None, :],
                            axis=-1, keepdims=True) + bias
    assert out2.shape == (B2, L2, 1)
    assert jnp.allclose(out2, ref2, atol=1e-4, rtol=1e-4)

    # --- Case 3: ragged M through the lanes kernel (cdiv trailing-block clip) -
    B3, L3 = 3, 50
    xt3 = jax.random.normal(k_x3, (N_DIMS, B3 * L3), dtype=jnp.float32)
    out3, attn3 = g_plaquette_softattn_t(xt3, B3, L3, embedding, weight, bias,
                                         k_gumbel)
    out3 = jax.block_until_ready(out3)
    x3_view = xt3.T.reshape(B3, L3, N_DIMS)
    ref3 = weight * jnp.sum(x3_view * attn3[None, None, :], axis=-1,
                            keepdims=True) + bias
    assert out3.shape == (B3, L3, 1)
    assert jnp.allclose(out3, ref3, atol=1e-5, rtol=1e-5)

    print("KERNEL_OK")
</pallas_src>

<mosaic_0001>
module attributes {stable_mosaic.version = 11 : i64} {
  func.func @_softattn_lanes_kernel(%arg0: i32, %arg1: memref<7xf32, #tpu.memory_space<smem>>, %arg2: memref<1xf32, #tpu.memory_space<smem>>, %arg3: memref<7x128xf32, #tpu.memory_space<vmem>>, %arg4: memref<1x128xf32, #tpu.memory_space<vmem>>) attributes {dimension_semantics = [#tpu.dimension_semantics<parallel>], iteration_bounds = array<i64: 1>, scalar_prefetch = 0 : i64, scratch_operands = 0 : i64, tpu.core_type = #tpu.core_type<tc>, window_params = [{transform_indices = @transform_0, window_bounds = array<i64: 7>}, {transform_indices = @transform_1, window_bounds = array<i64: 1>}, {transform_indices = @transform_2, window_bounds = array<i64: 7, 128>}, {transform_indices = @transform_3, window_bounds = array<i64: 1, 128>}]} {
    %c0 = arith.constant 0 : index
    %c0_0 = arith.constant 0 : index
    %0 = vector.load %arg3[%c0, %c0_0] : memref<7x128xf32, #tpu.memory_space<vmem>>, vector<1x128xf32>
    %c0_1 = arith.constant 0 : index
    %1 = memref.load %arg1[%c0_1] : memref<7xf32, #tpu.memory_space<smem>>
    %2 = vector.broadcast %1 : f32 to vector<1x128xf32>
    %3 = arith.mulf %0, %2 : vector<1x128xf32>
    %c1 = arith.constant 1 : index
    %c0_2 = arith.constant 0 : index
    %4 = vector.load %arg3[%c1, %c0_2] : memref<7x128xf32, #tpu.memory_space<vmem>>, vector<1x128xf32>
    %c1_3 = arith.constant 1 : index
    %5 = memref.load %arg1[%c1_3] : memref<7xf32, #tpu.memory_space<smem>>
    %6 = vector.broadcast %5 : f32 to vector<1x128xf32>
    %7 = arith.mulf %4, %6 : vector<1x128xf32>
    %8 = arith.addf %3, %7 : vector<1x128xf32>
    %c2 = arith.constant 2 : index
    %c0_4 = arith.constant 0 : index
    %9 = vector.load %arg3[%c2, %c0_4] : memref<7x128xf32, #tpu.memory_space<vmem>>, vector<1x128xf32>
    %c2_5 = arith.constant 2 : index
    %10 = memref.load %arg1[%c2_5] : memref<7xf32, #tpu.memory_space<smem>>
    %11 = vector.broadcast %10 : f32 to vector<1x128xf32>
    %12 = arith.mulf %9, %11 : vector<1x128xf32>
    %13 = arith.addf %8, %12 : vector<1x128xf32>
    %c3 = arith.constant 3 : index
    %c0_6 = arith.constant 0 : index
    %14 = vector.load %arg3[%c3, %c0_6] : memref<7x128xf32, #tpu.memory_space<vmem>>, vector<1x128xf32>
    %c3_7 = arith.constant 3 : index
    %15 = memref.load %arg1[%c3_7] : memref<7xf32, #tpu.memory_space<smem>>
    %16 = vector.broadcast %15 : f32 to vector<1x128xf32>
    %17 = arith.mulf %14, %16 : vector<1x128xf32>
    %18 = arith.addf %13, %17 : vector<1x128xf32>
    %c4 = arith.constant 4 : index
    %c0_8 = arith.constant 0 : index
    %19 = vector.load %arg3[%c4, %c0_8] : memref<7x128xf32, #tpu.memory_space<vmem>>, vector<1x128xf32>
    %c4_9 = arith.constant 4 : index
    %20 = memref.load %arg1[%c4_9] : memref<7xf32, #tpu.memory_space<smem>>
    %21 = vector.broadcast %20 : f32 to vector<1x128xf32>
    %22 = arith.mulf %19, %21 : vector<1x128xf32>
    %23 = arith.addf %18, %22 : vector<1x128xf32>
    %c5 = arith.constant 5 : index
    %c0_10 = arith.constant 0 : index
    %24 = vector.load %arg3[%c5, %c0_10] : memref<7x128xf32, #tpu.memory_space<vmem>>, vector<1x128xf32>
    %c5_11 = arith.constant 5 : index
    %25 = memref.load %arg1[%c5_11] : memref<7xf32, #tpu.memory_space<smem>>
    %26 = vector.broadcast %25 : f32 to vector<1x128xf32>
    %27 = arith.mulf %24, %26 : vector<1x128xf32>
    %28 = arith.addf %23, %27 : vector<1x128xf32>
    %c6 = arith.constant 6 : index
    %c0_12 = arith.constant 0 : index
    %29 = vector.load %arg3[%c6, %c0_12] : memref<7x128xf32, #tpu.memory_space<vmem>>, vector<1x128xf32>
    %c6_13 = arith.constant 6 : index
    %30 = memref.load %arg1[%c6_13] : memref<7xf32, #tpu.memory_space<smem>>
    %31 = vector.broadcast %30 : f32 to vector<1x128xf32>
    %32 = arith.mulf %29, %31 : vector<1x128xf32>
    %33 = arith.addf %28, %32 : vector<1x128xf32>
    %c0_14 = arith.constant 0 : index
    %34 = memref.load %arg2[%c0_14] : memref<1xf32, #tpu.memory_space<smem>>
    %35 = vector.broadcast %34 : f32 to vector<1x128xf32>
    %36 = arith.addf %33, %35 : vector<1x128xf32>
    %c0_15 = arith.constant 0 : index
    %c0_16 = arith.constant 0 : index
    %37 = vector.load %arg4[%c0_15, %c0_16] : memref<1x128xf32, #tpu.memory_space<vmem>>, vector<1x128xf32>
    tpu.vector_store %arg4[%c0_15, %c0_16], %36 {strides = array<i32>} : memref<1x128xf32, #tpu.memory_space<vmem>>, vector<1x128xf32>,
    return
  }
  func.func @transform_0(%arg0: i32) -> i32 {
    %c0_i32 = arith.constant 0 : i32
    %c0_i32_0 = arith.constant 0 : i32
    return %c0_i32 : i32
  }
  func.func @transform_1(%arg0: i32) -> i32 {
    %c0_i32 = arith.constant 0 : i32
    %c0_i32_0 = arith.constant 0 : i32
    return %c0_i32 : i32
  }
  func.func @transform_2(%arg0: i32) -> (i32, i32) {
    %c0_i32 = arith.constant 0 : i32
    %c0_i32_0 = arith.constant 0 : i32
    return %c0_i32, %arg0 : i32, i32
  }
  func.func @transform_3(%arg0: i32) -> (i32, i32) {
    %c0_i32 = arith.constant 0 : i32
    %c0_i32_0 = arith.constant 0 : i32
    return %c0_i32, %arg0 : i32, i32
  }
}

</mosaic_0001>

<bundles_post_ra>
// kernel: tpu_custom_call.1
= control target key start
LH: loop header
LB: loop body
LE: loop exit
PB: predicated region body
PF: predicated region fallthrough
CT: control target
= control target key end

     0   :  { %9 = vsyncpa [#allocation6], 0  ;;  %s209_s0 = inlined_call_operand.vmem [shape: f32[7], index: 0, kind: input, shape index: {}]   ;;  %s210_s1 = inlined_call_operand.<no memory space> [shape: f32[1], index: 1, kind: input, shape index: {}]   ;;  %s211_s2 = inlined_call_operand.hbm [shape: f32[7,128], index: 2, kind: input, shape index: {}]   ;;  %s212_s3 = inlined_call_operand.hbm [shape: f32[1,128], index: 3, kind: output, shape index: {}]  }
   0x1   :  { %10 = vsyncpa [#allocation4], 0 }
   0x2   :  { %11 = vsyncpa [#allocation5], 0  ;;  %s17_s14 = sshll.u32 %s209_s0, 4  ;;  %s28_s17 = sshll.u32 %s211_s2, 4  ;;  %s18_s14 = int_to_ptr.vmem [resolvable:$true] %s17_s14  ;;  %s29_s17 = int_to_ptr.hbm [resolvable:$true] %s28_s17 }
   0x3   :  { %s174_s18 = smov [#allocation3]   ;;  %s175_s19 = smov [#allocation7]  }
   0x4   :  { %20 = dma.vmem_to_smem %s18_s14, 16, %s174_s18, [#allocation6]  }
   0x5   :  { %s30_s20 = sshll.u32 %s175_s19, 4  ;;  %s31_s20 = int_to_ptr.vmem [resolvable:$true] %s30_s20 }
   0x6   :  { %33 = dma.hbm_to_vmem [thread:$0]  %s29_s17, 128, %s31_s20, [#allocation4]  }
   0x7   :  { %168 = dma.done.wait [#allocation6], 16  }
   0x8   :  { %169 = vsyncadd [#allocation6], 4294967280 }
   0x9   :  { %170 = dma.done.wait [#allocation4], 128  }
   0xa   :  { %171 = vsyncadd [#allocation4], 4294967168 }
   0xb   :  { %42 = sfence }
   0xc   :  { %s44_s21 = sld [smem:[#allocation3]]  ;;  %v43_v0 = vld [vmem:[#allocation7] sm:$0x1]  ;;  %v47_v1 = vld [vmem:[#allocation7 + $0x1] sm:$0x1]  ;;  %v78_v26 = vstv %s210_s1  ;;  %s176_s28 = smov [#allocation8]  }
   0xd   :  { %s99_s22 = sld [smem:[#allocation3 + $0x1]]  ;;  %v52_v3 = vld [vmem:[#allocation7 + $0x2] sm:$0x1]  ;;  %v57_v6 = vld [vmem:[#allocation7 + $0x3] sm:$0x1]  ;;  %s86_s29 = sshll.u32 %s176_s28, 4  ;;  %s87_s29 = int_to_ptr.vmem [resolvable:$true] %s86_s29 }
   0xe   :  { %s100_s0 = sld [smem:[#allocation3 + $0x2]]  ;;  %v62_v11 = vld [vmem:[#allocation7 + $0x4] sm:$0x1]  ;;  %v67_v15 = vld [vmem:[#allocation7 + $0x5] sm:$0x1]  ;;  %s88_s5 = sshll.u32 %s212_s3, 4  ;;  %s89_s5 = int_to_ptr.hbm [resolvable:$true] %s88_s5 }
   0xf   :  { %s101_s23 = sld [smem:[#allocation3 + $0x3]]  ;;  %v72_v19 = vld [vmem:[#allocation7 + $0x6] sm:$0x1] }
  0x10   :  { %s102_s24 = sld [smem:[#allocation3 + $0x4]] }
  0x11   :  { %s103_s2 = sld [smem:[#allocation3 + $0x5]] }
  0x12   :  { %v45_v2 = vstv %s44_s21  ;;  %s104_s25 = sld [smem:[#allocation3 + $0x6]] }
  0x13   :  { %v46_v4 = vmul.f32 %v45_v2, %v43_v0  ;;  %v49_v5 = vstv %s99_s22 }
  0x14   :  { %v50_v7 = vmul.f32 %v49_v5, %v47_v1  ;;  %v54_v8 = vstv %s100_s0 }
  0x15   :  { %v55_v9 = vmul.f32 %v54_v8, %v52_v3  ;;  %v59_v10 = vstv %s101_s23 }
  0x16   :  { %v51_v12 = vadd.f32 %v50_v7, %v46_v4  ;;  %v60_v13 = vmul.f32 %v59_v10, %v57_v6  ;;  %v64_v14 = vstv %s102_s24 }
  0x17   :  { %v69_v16 = vstv %s103_s2  ;;  %v65_v18 = vmul.f32 %v64_v14, %v62_v11 }
  0x18   :  { %v56_v17 = vadd.f32 %v55_v9, %v51_v12  ;;  %v74_v20 = vstv %s104_s25  ;;  %v70_v22 = vmul.f32 %v69_v16, %v67_v15 }
  0x19   :  { %v75_v24 = vmul.f32 %v74_v20, %v72_v19 }
  0x1a   :  { %v61_v21 = vadd.f32 %v60_v13, %v56_v17 }
  0x1c   :  { %v66_v23 = vadd.f32 %v65_v18, %v61_v21 }
  0x1e   :  { %v71_v25 = vadd.f32 %v70_v22, %v66_v23 }
  0x20   :  { %v76_v27 = vadd.f32 %v75_v24, %v71_v25 }
  0x22   :  { %v79_v28 = vadd.f32 %v78_v26, %v76_v27 }
  0x24   :  { %80 = vst [vmem:[#allocation8] sm:$0x1] %v79_v28 }
  0x25   :  { %91 = dma.vmem_to_hbm [thread:$0]  %s87_s29, 16, %s89_s5, [#allocation5]  }
  0x26   :  { %172 = dma.done.wait [#allocation5], 16  }
  0x27   :  { %173 = vsyncadd [#allocation5], 4294967280 }
  0x28   :  { %96 = vsyncpa [#allocation4], 1 }
  0x29   :  { %97 = vsyncpa [#allocation5], 1 }
  0x2a   :  { %98 = vsyncpa [#allocation6], 1 }

</bundles_post_ra>
